<compile_context>
chip_gen: v7x
topology: tpu7x:2x2x1
jax: 0.10.0
libtpu: 0.0.40
codegen_flags: <defaults>
</compile_context>

<pallas_src>
import jax
import jax.numpy as jnp
from jax import lax
from jax.experimental import pallas as pl
from jax.experimental.pallas import tpu as pltpu


def mlp_softmax_kernel(x_ref, w1_ref, w2_ref, w3_ref, b_ref, o_ref):
    H = w1_ref.shape[0]   # hidden size (64)
    C = w3_ref.shape[0]   # number of classes (3)

    # Packed biases: [b1 (H); b2 (H); b3 (C)], each a column vector (out, 1).
    b1 = b_ref[0:H, :]
    b2 = b_ref[H:2 * H, :]
    b3 = b_ref[2 * H:2 * H + C, :]

    x = x_ref[...]        # (TB, in) batch-major tile straight from HBM

    # Layer 1: (H, in) x (TB, in)^T -> (H, TB).  The x transpose is expressed
    # via dot_general contracting dims (in-kernel; XLU slot is otherwise idle),
    # putting batch on the 128-lane axis for everything downstream.
    h1 = lax.dot_general(w1_ref[...], x, (((1,), (1,)), ((), ())),
                         preferred_element_type=jnp.float32) + b1
    h1 = jnp.maximum(h1, 0.0)

    # Layer 2: Linear + ReLU
    h2 = jnp.dot(w2_ref[...], h1, preferred_element_type=jnp.float32) + b2
    h2 = jnp.maximum(h2, 0.0)

    # Output layer: (C, TB)
    logits = jnp.dot(w3_ref[...], h2, preferred_element_type=jnp.float32) + b3

    # Softmax over the class (sublane) axis.  Only C=3 classes, so reduce with
    # explicit elementwise ops on class slices (VPU) instead of an XLU reduce.
    m = logits[0:1, :]
    for c in range(1, C):
        m = jnp.maximum(m, logits[c:c + 1, :])
    e = jnp.exp(logits - m)
    denom = e[0:1, :]
    for c in range(1, C):
        denom = denom + e[c:c + 1, :]
    # Exact divide (NOT pl.reciprocal(approx=True)): rows must sum to 1 to f32
    # precision for downstream sampling / log-prob use.
    o_ref[...] = (e / denom).astype(o_ref.dtype)


def _round_up(n, m):
    return ((n + m - 1) // m) * m


def simple_rl_agent_forward(x, params, *, batch_tile=8192, class_major_output=False):
    """Forward pass of SimpleRLAgent.

    x: (B, input_size) float array (batch-major, as PyTorch would feed it).
    params: dict with w1/w2/w3 stored PyTorch-style (out, in) and b1/b2/b3 (out,).
    Returns (B, C) softmax probabilities, or (C, B) if class_major_output=True
    (skips the final layout-plumbing transpose for consumers that can take it).
    """
    w1 = params["w1"].astype(jnp.float32)
    w2 = params["w2"].astype(jnp.float32)
    w3 = params["w3"].astype(jnp.float32)
    b_all = jnp.concatenate(
        [params["b1"], params["b2"], params["b3"]]).reshape(-1, 1).astype(jnp.float32)

    B, in_size = x.shape
    C = w3.shape[0]
    LANE = 128

    # Batch tiling (batch lives on the 128-lane axis of the output):
    #  * round tiny batches up to one full vreg row (unmasked stores),
    #  * otherwise aim for >= 2 grid steps (v7x: two TensorCores split the
    #    "parallel" batch axis), capped at batch_tile.
    Bp = _round_up(B, LANE)
    TB = min(batch_tile, max(LANE, _round_up(pl.cdiv(Bp, 2), LANE)))
    Bp = _round_up(Bp, TB)

    xf = x.astype(jnp.float32)
    if Bp != B:
        # Zero-padded batch rows produce a bias-only softmax and are sliced off
        # below.  Feed B as a multiple of the tile to skip this copy entirely.
        xf = jnp.pad(xf, ((0, Bp - B), (0, 0)))

    grid = (Bp // TB,)
    # Weights/biases: constant index_map -> VMEM-resident across grid steps.
    resident = lambda shape: pl.BlockSpec(shape, lambda i: (0,) * len(shape))

    outT = pl.pallas_call(
        mlp_softmax_kernel,
        out_shape=jax.ShapeDtypeStruct((C, Bp), jnp.float32),
        grid=grid,
        in_specs=[
            pl.BlockSpec((TB, in_size), lambda i: (i, 0)),   # x tile, batch-major
            resident(w1.shape),
            resident(w2.shape),
            resident(w3.shape),
            resident(b_all.shape),
        ],
        out_specs=pl.BlockSpec((C, TB), lambda i: (0, i)),    # lane-dense store
        compiler_params=pltpu.CompilerParams(
            dimension_semantics=("parallel",)),
    )(xf, w1, w2, w3, b_all)

    probs = outT[:, :B]
    return probs if class_major_output else probs.T


def init_params(key, input_size=12, hidden_size=64, output_size=3):
    """torch.nn.Linear-style init: W (out, in), b (out,), U(-1/sqrt(fan_in), +1/sqrt(fan_in))."""
    ks = jax.random.split(key, 6)

    def lin(kw, kb, fan_in, fan_out):
        bound = 1.0 / jnp.sqrt(jnp.float32(fan_in))
        w = jax.random.uniform(kw, (fan_out, fan_in), jnp.float32, -bound, bound)
        b = jax.random.uniform(kb, (fan_out,), jnp.float32, -bound, bound)
        return w, b

    w1, b1 = lin(ks[0], ks[1], input_size, hidden_size)
    w2, b2 = lin(ks[2], ks[3], hidden_size, hidden_size)
    w3, b3 = lin(ks[4], ks[5], hidden_size, output_size)
    return {"w1": w1, "b1": b1, "w2": w2, "b2": b2, "w3": w3, "b3": b3}


def reference_forward(x, p):
    hp = lax.Precision.HIGHEST
    h1 = jnp.maximum(jnp.dot(x, p["w1"].T, precision=hp) + p["b1"], 0.0)
    h2 = jnp.maximum(jnp.dot(h1, p["w2"].T, precision=hp) + p["b2"], 0.0)
    logits = jnp.dot(h2, p["w3"].T, precision=hp) + p["b3"]
    return jax.nn.softmax(logits, axis=-1)


# TODO(synk): get_action's torch.multinomial sampling is host-side policy code,
# not part of the nn.Module forward, so it is intentionally not implemented here.

if __name__ == "__main__":
    key = jax.random.PRNGKey(0)
    k_params, k_x, k_x2 = jax.random.split(key, 3)

    input_size, hidden_size, output_size = 12, 64, 3
    params = init_params(k_params, input_size, hidden_size, output_size)

    # Small-batch path (padded to a single 128-lane block).
    batch = 8
    x = jax.random.normal(k_x, (batch, input_size), dtype=jnp.float32)
    out = jax.block_until_ready(simple_rl_agent_forward(x, params))
    ref = reference_forward(x, params)
    assert out.shape == (batch, output_size)
    assert jnp.allclose(out, ref, atol=2e-3, rtol=2e-3), "mismatch vs reference (small batch)"
    assert jnp.allclose(jnp.sum(out, axis=-1), 1.0, atol=1e-5), "rows do not sum to 1"

    # Gridded path: batch > tile and not a multiple of the tile (exercises
    # padding + a 2-step parallel grid with VMEM-resident weights).
    batch2 = 1000
    x2 = jax.random.normal(k_x2, (batch2, input_size), dtype=jnp.float32)
    out2 = jax.block_until_ready(
        simple_rl_agent_forward(x2, params, batch_tile=512))
    ref2 = reference_forward(x2, params)
    assert out2.shape == (batch2, output_size)
    assert jnp.allclose(out2, ref2, atol=2e-3, rtol=2e-3), "mismatch vs reference (gridded)"
    assert jnp.allclose(jnp.sum(out2, axis=-1), 1.0, atol=1e-5), "rows do not sum to 1 (gridded)"

    print("KERNEL_OK")
</pallas_src>

<mosaic_0001>
module attributes {stable_mosaic.version = 11 : i64} {
  func.func @mlp_softmax_kernel(%arg0: i32, %arg1: memref<128x12xf32, #tpu.memory_space<vmem>>, %arg2: memref<64x12xf32, #tpu.memory_space<vmem>>, %arg3: memref<64x64xf32, #tpu.memory_space<vmem>>, %arg4: memref<3x64xf32, #tpu.memory_space<vmem>>, %arg5: memref<131x1xf32, #tpu.memory_space<vmem>>, %arg6: memref<3x128xf32, #tpu.memory_space<vmem>>) attributes {dimension_semantics = [#tpu.dimension_semantics<parallel>], iteration_bounds = array<i64: 1>, scalar_prefetch = 0 : i64, scratch_operands = 0 : i64, tpu.core_type = #tpu.core_type<tc>, window_params = [{transform_indices = @transform_0, window_bounds = array<i64: 128, 12>}, {pipeline_mode = #tpu.pipeline_mode<synchronous>, transform_indices = @transform_1, window_bounds = array<i64: 64, 12>}, {pipeline_mode = #tpu.pipeline_mode<synchronous>, transform_indices = @transform_2, window_bounds = array<i64: 64, 64>}, {pipeline_mode = #tpu.pipeline_mode<synchronous>, transform_indices = @transform_3, window_bounds = array<i64: 3, 64>}, {pipeline_mode = #tpu.pipeline_mode<synchronous>, transform_indices = @transform_4, window_bounds = array<i64: 131, 1>}, {transform_indices = @transform_5, window_bounds = array<i64: 3, 128>}]} {
    %c0 = arith.constant 0 : index
    %c0_0 = arith.constant 0 : index
    %0 = vector.load %arg5[%c0, %c0_0] : memref<131x1xf32, #tpu.memory_space<vmem>>, vector<64x1xf32>
    %c64 = arith.constant 64 : index
    %c0_1 = arith.constant 0 : index
    %1 = vector.load %arg5[%c64, %c0_1] : memref<131x1xf32, #tpu.memory_space<vmem>>, vector<64x1xf32>
    %c128 = arith.constant 128 : index
    %c0_2 = arith.constant 0 : index
    %2 = vector.load %arg5[%c128, %c0_2] : memref<131x1xf32, #tpu.memory_space<vmem>>, vector<3x1xf32>
    %c0_3 = arith.constant 0 : index
    %c0_4 = arith.constant 0 : index
    %3 = vector.load %arg1[%c0_3, %c0_4] : memref<128x12xf32, #tpu.memory_space<vmem>>, vector<128x12xf32>
    %c0_5 = arith.constant 0 : index
    %c0_6 = arith.constant 0 : index
    %4 = vector.load %arg2[%c0_5, %c0_6] : memref<64x12xf32, #tpu.memory_space<vmem>>, vector<64x12xf32>
    %cst = arith.constant dense<0.000000e+00> : vector<64x128xf32>
    %5 = tpu.matmul %4, %3, %cst {dimension_numbers = #tpu.dot_dimension_numbers<[1], [1], [0], [0], [0, 0, 1, 0], [], []>} : vector<64x12xf32>, vector<128x12xf32>, vector<64x128xf32> -> vector<64x128xf32>
    %6 = vector.broadcast %0 : vector<64x1xf32> to vector<64x128xf32>
    %7 = arith.addf %5, %6 : vector<64x128xf32>
    %cst_7 = arith.constant 0.000000e+00 : f32
    %8 = vector.broadcast %cst_7 : f32 to vector<64x128xf32>
    %9 = arith.maximumf %7, %8 : vector<64x128xf32>
    %c0_8 = arith.constant 0 : index
    %c0_9 = arith.constant 0 : index
    %10 = vector.load %arg3[%c0_8, %c0_9] : memref<64x64xf32, #tpu.memory_space<vmem>>, vector<64x64xf32>
    %cst_10 = arith.constant dense<0.000000e+00> : vector<64x128xf32>
    %11 = tpu.matmul %10, %9, %cst_10 {dimension_numbers = #tpu.dot_dimension_numbers<[1], [0], [0], [1], [0, 0, 1, 1], [], []>} : vector<64x64xf32>, vector<64x128xf32>, vector<64x128xf32> -> vector<64x128xf32>
    %12 = vector.broadcast %1 : vector<64x1xf32> to vector<64x128xf32>
    %13 = arith.addf %11, %12 : vector<64x128xf32>
    %cst_11 = arith.constant 0.000000e+00 : f32
    %14 = vector.broadcast %cst_11 : f32 to vector<64x128xf32>
    %15 = arith.maximumf %13, %14 : vector<64x128xf32>
    %c0_12 = arith.constant 0 : index
    %c0_13 = arith.constant 0 : index
    %16 = vector.load %arg4[%c0_12, %c0_13] : memref<3x64xf32, #tpu.memory_space<vmem>>, vector<3x64xf32>
    %cst_14 = arith.constant dense<0.000000e+00> : vector<3x128xf32>
    %17 = tpu.matmul %16, %15, %cst_14 {dimension_numbers = #tpu.dot_dimension_numbers<[1], [0], [0], [1], [0, 0, 1, 1], [], []>} : vector<3x64xf32>, vector<64x128xf32>, vector<3x128xf32> -> vector<3x128xf32>
    %18 = vector.broadcast %2 : vector<3x1xf32> to vector<3x128xf32>
    %19 = arith.addf %17, %18 : vector<3x128xf32>
    %20 = vector.extract_strided_slice %19 {offsets = [0, 0], sizes = [1, 128], strides = [1, 1]} : vector<3x128xf32> to vector<1x128xf32>
    %21 = vector.extract_strided_slice %19 {offsets = [1, 0], sizes = [1, 128], strides = [1, 1]} : vector<3x128xf32> to vector<1x128xf32>
    %22 = arith.maximumf %20, %21 : vector<1x128xf32>
    %23 = vector.extract_strided_slice %19 {offsets = [2, 0], sizes = [1, 128], strides = [1, 1]} : vector<3x128xf32> to vector<1x128xf32>
    %24 = arith.maximumf %22, %23 : vector<1x128xf32>
    %25 = vector.broadcast %24 : vector<1x128xf32> to vector<3x128xf32>
    %26 = arith.subf %19, %25 : vector<3x128xf32>
    %27 = math.exp %26 : vector<3x128xf32>
    %28 = vector.extract_strided_slice %27 {offsets = [0, 0], sizes = [1, 128], strides = [1, 1]} : vector<3x128xf32> to vector<1x128xf32>
    %29 = vector.extract_strided_slice %27 {offsets = [1, 0], sizes = [1, 128], strides = [1, 1]} : vector<3x128xf32> to vector<1x128xf32>
    %30 = arith.addf %28, %29 : vector<1x128xf32>
    %31 = vector.extract_strided_slice %27 {offsets = [2, 0], sizes = [1, 128], strides = [1, 1]} : vector<3x128xf32> to vector<1x128xf32>
    %32 = arith.addf %30, %31 : vector<1x128xf32>
    %33 = vector.broadcast %32 : vector<1x128xf32> to vector<3x128xf32>
    %34 = arith.divf %27, %33 : vector<3x128xf32>
    %c0_15 = arith.constant 0 : index
    %c0_16 = arith.constant 0 : index
    %35 = vector.load %arg6[%c0_15, %c0_16] : memref<3x128xf32, #tpu.memory_space<vmem>>, vector<3x128xf32>
    tpu.vector_store %arg6[%c0_15, %c0_16], %34 {strides = array<i32>} : memref<3x128xf32, #tpu.memory_space<vmem>>, vector<3x128xf32>,
    return
  }
  func.func @transform_0(%arg0: i32) -> (i32, i32) {
    %c0_i32 = arith.constant 0 : i32
    %c0_i32_0 = arith.constant 0 : i32
    return %arg0, %c0_i32 : i32, i32
  }
  func.func @transform_1(%arg0: i32) -> (i32, i32) {
    %c0_i32 = arith.constant 0 : i32
    %c0_i32_0 = arith.constant 0 : i32
    %c0_i32_1 = arith.constant 0 : i32
    return %c0_i32, %c0_i32_0 : i32, i32
  }
  func.func @transform_2(%arg0: i32) -> (i32, i32) {
    %c0_i32 = arith.constant 0 : i32
    %c0_i32_0 = arith.constant 0 : i32
    %c0_i32_1 = arith.constant 0 : i32
    return %c0_i32, %c0_i32_0 : i32, i32
  }
  func.func @transform_3(%arg0: i32) -> (i32, i32) {
    %c0_i32 = arith.constant 0 : i32
    %c0_i32_0 = arith.constant 0 : i32
    %c0_i32_1 = arith.constant 0 : i32
    return %c0_i32, %c0_i32_0 : i32, i32
  }
  func.func @transform_4(%arg0: i32) -> (i32, i32) {
    %c0_i32 = arith.constant 0 : i32
    %c0_i32_0 = arith.constant 0 : i32
    %c0_i32_1 = arith.constant 0 : i32
    return %c0_i32, %c0_i32_0 : i32, i32
  }
  func.func @transform_5(%arg0: i32) -> (i32, i32) {
    %c0_i32 = arith.constant 0 : i32
    %c0_i32_0 = arith.constant 0 : i32
    return %c0_i32, %arg0 : i32, i32
  }
}

</mosaic_0001>

<bundles_post_ra>
// kernel: tpu_custom_call.1
= control target key start
LH: loop header
LB: loop body
LE: loop exit
PB: predicated region body
PF: predicated region fallthrough
CT: control target
= control target key end

     0   :  { %vm102_vm0 = vcmask 97280   ;;  %v879_v6 = vmov 0   ;;  %s1131_s0 = inlined_call_operand.vmem [shape: f32[128,12], index: 0, kind: input, shape index: {}]   ;;  %s1132_s1 = inlined_call_operand.vmem [shape: f32[64,12], index: 1, kind: input, shape index: {}]   ;;  %s1133_s2 = inlined_call_operand.vmem [shape: f32[64,64], index: 2, kind: input, shape index: {}]   ;;  %s1134_s3 = inlined_call_operand.vmem [shape: f32[3,64], index: 3, kind: input, shape index: {}]   ;;  %s1135_s4 = inlined_call_operand.vmem [shape: f32[131,1], index: 4, kind: input, shape index: {}]   ;;  %s1136_s5 = inlined_call_operand.hbm [shape: f32[3,128], index: 5, kind: output, shape index: {}]  }
   0x1   :  { %v38_v0 = vld [vmem:[%s1131_s0] sm:$0xff]  ;;  %v39_v1 = vld [vmem:[%s1131_s0 + $0x8] sm:$0xff]  ;;  %v40_v2 = vld [vmem:[%s1131_s0 + $0x10] sm:$0xff]  ;;  %849 = vset.pattern.permute.xlu0 %v879_v6  ;;  %850 = vset.pattern.permute.xlu1 %v879_v6 }
   0x2   :  { %v768_v3 = vpack.c.bf16 %v39_v1, %v38_v0  ;;  %vm925_vm1 = vmpackc.low %vm102_vm0, %vm102_vm0  ;;  %v41_v5 = vld [vmem:[%s1131_s0 + $0x18] sm:$0xff]  ;;  %v54_v8 = vld [vmem:[%s1132_s1] sm:$0xff] }
   0x3   :  { %v774_v7 = vpack.c.bf16 %v41_v5, %v40_v2  ;;  %v42_v9 = vld [vmem:[%s1131_s0 + $0x20] sm:$0xff]  ;;  %v43_v10 = vld [vmem:[%s1131_s0 + $0x28] sm:$0xff]  ;;  %709 = vmatprep.mubr.msk.f32.mxu0 %vm102_vm0, %v54_v8  ;;  %v23_v13 = vld [vmem:[%s1135_s4 + $0x10] sm:$0xff] }
   0x4   :  { %770 = vmatprep.subr.msk.bf16.mxu0 %vm925_vm1, %v768_v3  ;;  %v21_v11 = vld [vmem:[%s1135_s4] sm:$0xff]  ;;  %v780_v12 = vpack.c.bf16 %v43_v10, %v42_v9  ;;  %v22_v14 = vld [vmem:[%s1135_s4 + $0x8] sm:$0xff]  ;;  %74 = vperm.xlu1 %850, %v23_v13   ;;  %v24_v15 = vld [vmem:[%s1135_s4 + $0x18] sm:$0xff] }
   0x5   :  { %773 = vmatpush3.bf16.xpose.msk.msra.mxu0 %vm925_vm1, %v768_v3  ;;  %64 = vperm.xlu0 %849, %v21_v11   ;;  %v44_v16 = vld [vmem:[%s1131_s0 + $0x30] sm:$0xff]  ;;  %v45_v17 = vld [vmem:[%s1131_s0 + $0x38] sm:$0xff]  ;;  %v25_v18 = vld [vmem:[%s1135_s4 + $0x20] sm:$0xff] }
   0x6   :  { %776 = vmatprep.subr.msk.bf16.mxu0 %vm925_vm1, %v774_v7 }
   0x8   :  { %79 = vperm.xlu1 %850, %v24_v15  }
   0x9   :  { %69 = vperm.xlu0 %849, %v22_v14  }
   0xd   :  { %779 = vmatpush3.bf16.xpose.msk.msra.mxu0 %vm925_vm1, %v774_v7 }
   0xe   :  { %782 = vmatprep.subr.msk.bf16.mxu0 %vm925_vm1, %v780_v12 }
   0xf   :  { %10 = vsyncpa [#allocation3], 0  ;;  %v26_v19 = vld [vmem:[%s1135_s4 + $0x28] sm:$0xff]  ;;  %v786_v20 = vpack.c.bf16 %v45_v17, %v44_v16  ;;  %84 = vperm.xlu0 %849, %v25_v18   ;;  %v27_v21 = vld [vmem:[%s1135_s4 + $0x30] sm:$0xff]  ;;  %vm336_vm2 = vcmask 523264   ;;  %vm881_vm3 = vmmov 0  }
  0x10   :  { %89 = vperm.xlu1 %850, %v26_v19   ;;  %v28_v22 = vld [vmem:[%s1135_s4 + $0x38] sm:$0xff]  ;;  %v46_v23 = vld [vmem:[%s1131_s0 + $0x40] sm:$0xff]  ;;  %v47_v24 = vld [vmem:[%s1131_s0 + $0x48] sm:$0xff] }
  0x11   :  { %v29_v25 = vld [vmem:[%s1135_s4 + $0x40] sm:$0xff]  ;;  %v30_v26 = vld [vmem:[%s1135_s4 + $0x48] sm:$0xff]  ;;  %v792_v27 = vpack.c.bf16 %v47_v24, %v46_v23  ;;  %v31_v28 = vld [vmem:[%s1135_s4 + $0x50] sm:$0xff] }
  0x12   :  { %v32_v29 = vld [vmem:[%s1135_s4 + $0x58] sm:$0xff]  ;;  %v48_v30 = vld [vmem:[%s1131_s0 + $0x50] sm:$0xff]  ;;  %v33_v32 = vld [vmem:[%s1135_s4 + $0x60] sm:$0xff] }
  0x13   :  { %94 = vperm.xlu0 %849, %v27_v21   ;;  %v49_v31 = vld [vmem:[%s1131_s0 + $0x58] sm:$0xff]  ;;  %v34_v33 = vld [vmem:[%s1135_s4 + $0x68] sm:$0xff]  ;;  %v35_v35 = vld [vmem:[%s1135_s4 + $0x70] sm:$0xff] }
  0x14   :  { %99 = vperm.xlu1 %850, %v28_v22   ;;  %v798_v34 = vpack.c.bf16 %v49_v31, %v48_v30  ;;  %v36_v36 = vld [vmem:[%s1135_s4 + $0x78] sm:$0xff]  ;;  %v50_v37 = vld [vmem:[%s1131_s0 + $0x60] sm:$0xff]  ;;  %v51_v38 = vld [vmem:[%s1131_s0 + $0x68] sm:$0xff]  ;;  %v880_v31 = vmov 0.0|0.0  }
  0x15   :  { %785 = vmatpush3.bf16.xpose.msk.msra.mxu0 %vm925_vm1, %v780_v12  ;;  %v37_v39 = vld [vmem:[%s1135_s4 + $0x80] sm:$0x7]  ;;  %v804_v40 = vpack.c.bf16 %v51_v38, %v50_v37  ;;  %v52_v41 = vld [vmem:[%s1131_s0 + $0x70] sm:$0xff]  ;;  %v53_v42 = vld [vmem:[%s1131_s0 + $0x78] sm:$0xff] }
  0x16   :  { %788 = vmatprep.subr.msk.bf16.mxu0 %vm925_vm1, %v786_v20  ;;  %v810_v43 = vpack.c.bf16 %v53_v42, %v52_v41  ;;  %v55_v44 = vld [vmem:[%s1132_s1 + $0x8] sm:$0xff]  ;;  %v56_v45 = vld [vmem:[%s1132_s1 + $0x10] sm:$0xff]  ;;  %v57_v46 = vld [vmem:[%s1132_s1 + $0x18] sm:$0xff] }
  0x17   :  { %298 = vperm.xlu0 %849, %v29_v25   ;;  %v58_v47 = vld [vmem:[%s1132_s1 + $0x20] sm:$0xff]  ;;  %v59_v48 = vld [vmem:[%s1132_s1 + $0x28] sm:$0xff]  ;;  %v60_v49 = vld [vmem:[%s1132_s1 + $0x30] sm:$0xff] }
  0x18   :  { %303 = vperm.xlu1 %850, %v30_v26   ;;  %v61_v50 = vld [vmem:[%s1132_s1 + $0x38] sm:$0xff]  ;;  %v288_v51 = vld [vmem:[%s1133_s2] sm:$0xff]  ;;  %v289_v24 = vld [vmem:[%s1133_s2 + $0x8] sm:$0xff] }
  0x19   :  { %737 = vmatprep.mubr.msk.f32.mxu1 %vm336_vm2, %v288_v51  ;;  %v290_v25 = vld [vmem:[%s1133_s2 + $0x10] sm:$0xff]  ;;  %v291_v26 = vld [vmem:[%s1133_s2 + $0x18] sm:$0xff] }
  0x1a   :  { %v295_v30 = vld [vmem:[%s1133_s2 + $0x38] sm:$0xff] }
  0x1b   :  { %308 = vperm.xlu0 %849, %v31_v28   ;;  %v293_v28 = vld [vmem:[%s1133_s2 + $0x28] sm:$0xff] }
  0x1c   :  { %313 = vperm.xlu1 %850, %v32_v29   ;;  %v294_v29 = vld [vmem:[%s1133_s2 + $0x30] sm:$0xff] }
  0x1d   :  { %791 = vmatpush3.bf16.xpose.msk.msra.mxu0 %vm925_vm1, %v786_v20 }
  0x1e   :  { %794 = vmatprep.subr.msk.bf16.mxu0 %vm925_vm1, %v792_v27 }
  0x1f   :  { %318 = vperm.xlu0 %849, %v33_v32   ;;  %v882_v32 = vmov 0.0  }
  0x20   :  { %323 = vperm.xlu1 %850, %v34_v33  }
  0x23   :  { %328 = vperm.xlu0 %849, %v35_v35  }
  0x24   :  { %333 = vperm.xlu1 %850, %v36_v36  }
  0x25   :  { %797 = vmatpush3.bf16.xpose.msk.msra.mxu0 %vm925_vm1, %v792_v27  ;;  %v292_v27 = vld [vmem:[%s1133_s2 + $0x20] sm:$0xff] }
  0x26   :  { %800 = vmatprep.subr.msk.bf16.mxu0 %vm925_vm1, %v798_v34 }
  0x27   :  { %477 = vperm.xlu0 %849, %v37_v39  }
  0x2d   :  { %803 = vmatpush3.bf16.xpose.msk.msra.mxu0 %vm925_vm1, %v798_v34 }
  0x2e   :  { %806 = vmatprep.subr.msk.bf16.mxu0 %vm925_vm1, %v804_v40 }
  0x35   :  { %809 = vmatpush3.bf16.xpose.msk.msra.mxu0 %vm925_vm1, %v804_v40 }
  0x36   :  { %812 = vmatprep.subr.msk.bf16.mxu0 %vm925_vm1, %v810_v43 }
  0x3d   :  { %815 = vmatpush3.bf16.xpose.msk.msra.mxu0 %vm925_vm1, %v810_v43 }
  0x44   :  { %710 = vmatmul.mubr.msk.f32.vlgmr.msra.gmra.mrb[0].mxu0 %vm102_vm0, %v55_v44 }
  0x45   :  { %712 = vmatprep.mubr.msk.f32.mxu0 %vm102_vm0, %v56_v45 }
  0x48   :  { %713 = vmatmul.mubr.msk.f32.gmra.mrb[2].mxu0 %vm102_vm0, %v57_v46 }
  0x49   :  { %715 = vmatprep.mubr.msk.f32.mxu0 %vm102_vm0, %v58_v47 }
  0x4c   :  { %716 = vmatmul.mubr.msk.f32.gmra.mrb[4].mxu0 %vm102_vm0, %v59_v48 }
  0x4d   :  { %718 = vmatprep.mubr.msk.f32.mxu0 %vm102_vm0, %v60_v49 }
  0x50   :  { %719 = vmatmul.mubr.msk.f32.gmra.mrb[6].mxu0 %vm102_vm0, %v61_v50 }
  0x83   :  { %v75_v53 = vpop.permute.xlu1 %74 }
  0x84   :  { %v65_v52 = vpop.permute.xlu0 %64 }
  0x87   :  { %v80_v55 = vpop.permute.xlu1 %79 }
  0x88   :  { %v70_v54 = vpop.permute.xlu0 %69 }
  0x8e   :  { %v85_v4 = vpop.permute.xlu0 %84 }
  0x8f   :  { %v90_v1 = vpop.permute.xlu1 %89 }
  0x92   :  { %v95_v16 = vpop.permute.xlu0 %94 }
  0x93   :  { %v100_v13 = vpop.permute.xlu1 %99 }
  0x96   :  { %v299_v34 = vpop.permute.xlu0 %298 }
  0x97   :  { %v304_v33 = vpop.permute.xlu1 %303 }
  0x9a   :  { %v309_v37 = vpop.permute.xlu0 %308 }
  0x9b   :  { %v314_v35 = vpop.permute.xlu1 %313 }
  0x9e   :  { %v319_v49 = vpop.permute.xlu0 %318 }
  0x9f   :  { %v324_v46 = vpop.permute.xlu1 %323 }
 0x117   :  { %v711_v56 = vpop.f32.mrb[0].mxu0 }
 0x118   :  { %v247_v57 = vadd.f32 %v711_v56, %v70_v54  ;;  %v241_v58 = vpop.f32.mrb[1].mxu0 }
 0x119   :  { %v242_v59 = vadd.f32 %v241_v58, %v65_v52  ;;  %v334_v58 = vpop.permute.xlu1 %333 }
 0x11a   :  { %v281_v60 = vmax.f32 %v247_v57, 0.0 }
 0x11b   :  { %v280_v61 = vmax.f32 %v242_v59, 0.0  ;;  %v714_v62 = vpop.f32.mrb[2].mxu0 }
 0x11c   :  { %v257_v63 = vadd.f32 %v714_v62, %v80_v55  ;;  %v251_v0 = vpop.f32.mrb[3].mxu0 }
 0x11d   :  { %v252_v2 = vadd.f32 %v251_v0, %v75_v53  ;;  %v816_v3 = vpack.c.bf16 %v281_v60, %v280_v61  ;;  %v329_v61 = vpop.permute.xlu0 %328 }
 0x11e   :  { %v283_v5 = vmax.f32 %v257_v63, 0.0 }
 0x11f   :  { %v282_v6 = vmax.f32 %v252_v2, 0.0  ;;  %v717_v7 = vpop.f32.mrb[4].mxu0  ;;  %817 = vmatprep.subr.bf16.mxu1 %v816_v3 }
 0x120   :  { %v267_v8 = vadd.f32 %v717_v7, %v90_v1  ;;  %v261_v9 = vpop.f32.mrb[5].mxu0  ;;  %819 = vmatpush3.bf16.msra.mxu1 %v816_v3 }
 0x121   :  { %v820_v10 = vpack.c.bf16 %v283_v5, %v282_v6  ;;  %v262_v11 = vadd.f32 %v261_v9, %v85_v4  ;;  %v474_v5 = vld [vmem:[%s1134_s3] sm:$0x7]  ;;  %v560_v6 = vlaneseq  ;;  %v478_v7 = vpop.permute.xlu0 %477  ;;  %s883_s3 = smov [#allocation2]  }
 0x122   :  { %v285_v12 = vmax.f32 %v267_v8, 0.0  ;;  %s587_s13 = sshll.u32 %s883_s3, 4  ;;  %s588_s13 = int_to_ptr.vmem [resolvable:$true] %s587_s13 }
 0x123   :  { %v284_v14 = vmax.f32 %v262_v11, 0.0  ;;  %v720_v15 = vpop.f32.mrb[6].mxu0  ;;  %821 = vmatprep.subr.bf16.mxu1 %v820_v10  ;;  %s855_s0 = scalar_lea.vmem %s588_s13, 64  ;;  %p860_p1 = scmp.lt.s32.totalorder %s588_s13, %s588_s13 }
 0x124   :  { %v277_v17 = vadd.f32 %v720_v15, %v100_v13  ;;  %v271_v18 = vpop.f32.mrb[7].mxu0  ;;  %823 = vmatpush3.bf16.msra.mxu1 %v820_v10  ;;  %v561_v10 = vshrl.u32 %v560_v6, 7  ;;  %p856_p0 = scmp.ne.s32.totalorder %s588_s13, %s855_s0  ;;  %p861_p2 = scmp.lt.s32.totalorder %s855_s0, %s855_s0 }
 0x125   :  { %v824_v19 = vpack.c.bf16 %v285_v12, %v284_v14  ;;  %v272_v20 = vadd.f32 %v271_v18, %v95_v16 }
 0x126   :  { %v287_v21 = vmax.f32 %v277_v17, 0.0  ;;  %v562_v15 = vsub.s32 0, %v561_v10  ;;  %p862_p3 = por %p861_p2, %p860_p1 }
 0x127   :  { %v286_v22 = vmax.f32 %v272_v20, 0.0  ;;  %825 = vmatprep.subr.bf16.mxu1 %v824_v19 }
 0x128   :  { %827 = vmatpush3.bf16.msra.mxu1 %v824_v19  ;;  %p863_p4 = pnand %p862_p3, %p856_p0 }
 0x129   :  { %v828_v23 = vpack.c.bf16 %v287_v21, %v286_v22 }
 0x12b   :  { %829 = vmatprep.subr.bf16.mxu1 %v828_v23 }
 0x12c   :  { %831 = vmatpush3.bf16.msra.mxu1 %v828_v23 }
 0x12d   :  { %832 = vmatprep.subr.bf16.mxu1 %v880_v31 }
 0x12f   :  { %738 = vmatmul.mubr.msk.f32.vlgmr.msra.gmra.mrb[0].mxu1 %vm336_vm2, %v289_v24 }
 0x130   :  { %740 = vmatprep.mubr.msk.f32.mxu1 %vm336_vm2, %v290_v25 }
 0x133   :  { %741 = vmatmul.mubr.msk.f32.gmra.mrb[2].mxu1 %vm336_vm2, %v291_v26 }
 0x134   :  { %743 = vmatprep.mubr.msk.f32.mxu1 %vm336_vm2, %v292_v27 }
 0x137   :  { %744 = vmatmul.mubr.msk.f32.gmra.mrb[4].mxu1 %vm336_vm2, %v293_v28 }
 0x138   :  { %746 = vmatprep.mubr.msk.f32.mxu1 %vm336_vm2, %v294_v29 }
 0x13b   :  { %747 = vmatmul.mubr.msk.f32.gmra.mrb[6].mxu1 %vm336_vm2, %v295_v30 }
 0x13c   :  { %765 = vmatprep.mubr.msk.f32.mxu1 %vm881_vm3, %v882_v32 }
 0x202   :  { %v739_v36 = vpop.f32.mrb[0].mxu1 }
 0x203   :  { %v433_v38 = vadd.f32 %v739_v36, %v304_v33  ;;  %v427_v39 = vpop.f32.mrb[1].mxu1 }
 0x204   :  { %v428_v40 = vadd.f32 %v427_v39, %v299_v34 }
 0x205   :  { %v467_v41 = vmax.f32 %v433_v38, 0.0 }
 0x206   :  { %v466_v42 = vmax.f32 %v428_v40, 0.0  ;;  %v742_v43 = vpop.f32.mrb[2].mxu1 }
 0x207   :  { %v443_v44 = vadd.f32 %v742_v43, %v314_v35  ;;  %v437_v45 = vpop.f32.mrb[3].mxu1 }
 0x208   :  { %v833_v47 = vpack.c.bf16 %v467_v41, %v466_v42  ;;  %v438_v48 = vadd.f32 %v437_v45, %v309_v37 }
 0x209   :  { %v469_v50 = vmax.f32 %v443_v44, 0.0 }
 0x20a   :  { %v468_v51 = vmax.f32 %v438_v48, 0.0  ;;  %v745_v52 = vpop.f32.mrb[4].mxu1  ;;  %834 = vmatpush3.bf16.msra.mxu1 %v833_v47 }
 0x20b   :  { %v453_v53 = vadd.f32 %v745_v52, %v324_v46  ;;  %v447_v54 = vpop.f32.mrb[5].mxu1  ;;  %835 = vmatprep.subr.bf16.mxu1 %v880_v31 }
 0x20c   :  { %v836_v55 = vpack.c.bf16 %v469_v50, %v468_v51  ;;  %v448_v56 = vadd.f32 %v447_v54, %v319_v49 }
 0x20d   :  { %v471_v57 = vmax.f32 %v453_v53, 0.0 }
 0x20e   :  { %v470_v59 = vmax.f32 %v448_v56, 0.0  ;;  %v748_v60 = vpop.f32.mrb[6].mxu1  ;;  %837 = vmatpush3.bf16.msra.mxu1 %v836_v55 }
 0x20f   :  { %v463_v62 = vadd.f32 %v748_v60, %v334_v58  ;;  %v457_v63 = vpop.f32.mrb[7].mxu1  ;;  %838 = vmatprep.subr.bf16.mxu1 %v880_v31 }
 0x210   :  { %v839_v0 = vpack.c.bf16 %v471_v57, %v470_v59  ;;  %v458_v1 = vadd.f32 %v457_v63, %v329_v61 }
 0x211   :  { %v473_v2 = vmax.f32 %v463_v62, 0.0 }
 0x212   :  { %v472_v3 = vmax.f32 %v458_v1, 0.0  ;;  %840 = vmatpush3.bf16.msra.mxu1 %v839_v0 }
 0x213   :  { %841 = vmatprep.subr.bf16.mxu1 %v880_v31 }
 0x214   :  { %v842_v4 = vpack.c.bf16 %v473_v2, %v472_v3 }
 0x216   :  { %843 = vmatpush3.bf16.msra.mxu1 %v842_v4 }
 0x219   :  { %766 = vmatmul.mubr.msk.f32.vlgmr.msra.gmra.mrb[8].mxu1 %vm336_vm2, %v474_v5 }
 0x2ec   :  { %v549_v8 = vpop.f32.mrb[8].mxu1 }
 0x2ed   :  { %v550_v9 = vadd.f32 %v549_v8, %v478_v7  ;;  %v767_v11 = vpop.f32.mrb[9].mxu1 }
 0x2ef   :  { %v554_v12 = vrot.slane %v550_v9, 1  ;;  %v557_v14 = vrot.slane %v550_v9, 2 }
 0x2f1   :  { %v556_v13 = vmax.f32 %v550_v9, %v554_v12 }
 0x2f3   :  { %v559_v16 = vmax.f32 %v556_v13, %v557_v14 }
 0x2f5   :  { %v563_v17 = vrot.slane %v559_v16, %v562_v15 }
 0x2f7   :  { %v564_v18 = vsub.f32 %v550_v9, %v563_v17 }
 0x2f9   :  { %v565_v19 = vmul.f32 1.442695, %v564_v18 }
 0x2fb   :  { %851 = vpow2.f32 %v565_v19 }
 0x305   :  { %v852_v20 = vpop.eup %851 }
 0x306   :  { %v568_v21 = vrot.slane %v852_v20, 1  ;;  %v571_v23 = vrot.slane %v852_v20, 2 }
 0x308   :  { %v570_v22 = vadd.f32 %v852_v20, %v568_v21 }
 0x30a   :  { %v573_v24 = vadd.f32 %v571_v23, %v570_v22 }
 0x30c   :  { %v577_v25 = vrot.slane %v573_v24, %v562_v15 }
 0x30e   :  { %853 = vrcp.f32 %v577_v25 }
 0x318   :  { %v854_v26 = vpop.eup %853 }
 0x319   :  { %v579_v27 = vmul.f32 %v854_v26, %v852_v20 }
 0x31b   :  { %580 = vst [vmem:[#allocation2] sm:$0x7] %v579_v27 }
 0x31c   :  { %866 = shalt.err (!%p863_p4)
}
 0x31d   :  { %s867_s16 = scalar_lea.hbm %s1136_s5, 64 }
 0x31e   :  { %p868_p5 = scmp.ne.s32.totalorder %s1136_s5, %s867_s16  ;;  %p871_p6 = scmp.lt.u32.totalorder %s867_s16, %s1136_s5 }
 0x320   :  { %p873_p7 = pnand %p871_p6, %p868_p5 }
 0x322   :  { %876 = shalt.err (!%p873_p7)
}
 0x323   :  { %590 = dma.vmem_to_hbm [thread:$0]  %s588_s13, 64, %s1136_s5, [#allocation3]  }
 0x324   :  { %877 = dma.done.wait [#allocation3], 64  }
 0x325   :  { %878 = vsyncadd [#allocation3], 4294967232 }
 0x326   :  { %594 = vsyncpa [#allocation3], 1 }

</bundles_post_ra>
